<compile_context>
chip_gen: v7x
topology: tpu7x:2x2x1
jax: 0.10.0
libtpu: 0.0.40
codegen_flags: <defaults>
</compile_context>

<pallas_src>
import functools

import jax
import jax.numpy as jnp
from jax.experimental import pallas as pl
from jax.experimental.pallas import tpu as pltpu


def _round_up(n, m):
    return ((n + m - 1) // m) * m


def _actor_kernel(x_ref,
                  w1_ref, b1_ref,
                  w2_ref, b2_ref,
                  w3_ref, b3_ref,
                  w4_ref, b4_ref,
                  o_ref,
                  *, max_action):
    """One batch tile of the fused 4-layer MLP.

    Matmul operands are bf16 (MXU native) with f32 accumulation; bias/ReLU/tanh
    epilogues stay f32 on the VPU/EUP. Weights are VMEM-resident across the
    whole batch grid (their index_map is constant).
    """
    x = x_ref[...]

    # fc1 + ReLU
    h = jnp.dot(x.astype(jnp.bfloat16), w1_ref[...],
                preferred_element_type=jnp.float32) + b1_ref[...]
    h = jnp.maximum(h, 0.0)

    # fc2 + ReLU
    h = jnp.dot(h.astype(jnp.bfloat16), w2_ref[...],
                preferred_element_type=jnp.float32) + b2_ref[...]
    h = jnp.maximum(h, 0.0)

    # fc3 + ReLU
    h = jnp.dot(h.astype(jnp.bfloat16), w3_ref[...],
                preferred_element_type=jnp.float32) + b3_ref[...]
    h = jnp.maximum(h, 0.0)

    # action_out + tanh (EUP); scalar scale only if max_action != 1 (static).
    a = jnp.dot(h.astype(jnp.bfloat16), w4_ref[...],
                preferred_element_type=jnp.float32) + b4_ref[...]
    a = jnp.tanh(a)
    if max_action != 1.0:
        a = max_action * a
    o_ref[...] = a


def prepare_params(params):
    """One-time padding/casting of raw (in,out)-layout f32 params.

    Call this once at init; `actor_forward` takes the prepared dict so the hot
    path never rebuilds padded weight slabs.
    """
    (w1, b1), (w2, b2), (w3, b3), (w4, b4) = params
    in_dim, hidden = w1.shape
    act_dim = w4.shape[1]
    in_pad = _round_up(in_dim, 128)     # lane-aligned K for fc1
    out_pad = _round_up(act_dim, 128)   # lane-dense output

    w1_p = jnp.zeros((in_pad, hidden), jnp.bfloat16).at[:in_dim, :].set(
        w1.astype(jnp.bfloat16))
    w4_p = jnp.zeros((hidden, out_pad), jnp.bfloat16).at[:, :act_dim].set(
        w4.astype(jnp.bfloat16))
    b4_p = jnp.zeros((1, out_pad), jnp.float32).at[:, :act_dim].set(
        b4.reshape(1, -1).astype(jnp.float32))

    tensors = (
        w1_p, b1.reshape(1, hidden).astype(jnp.float32),
        w2.astype(jnp.bfloat16), b2.reshape(1, hidden).astype(jnp.float32),
        w3.astype(jnp.bfloat16), b3.reshape(1, hidden).astype(jnp.float32),
        w4_p, b4_p,
    )
    return {
        "in_dim": in_dim, "act_dim": act_dim, "hidden": hidden,
        "in_pad": in_pad, "out_pad": out_pad,
        "tensors": tensors,
    }


@functools.partial(jax.jit, static_argnames=("act_dim", "max_action", "tile_b"))
def _actor_forward_jit(x, tensors, *, act_dim, max_action, tile_b):
    """Jitted pad -> fused Pallas MLP -> slice. x: [batch, obs+goal] f32."""
    (w1_p, b1, w2, b2, w3, b3, w4_p, b4_p) = tensors
    batch, in_dim = x.shape
    in_pad, hidden = w1_p.shape
    out_pad = w4_p.shape[1]

    # Batch tiling: pick num_tiles first, then the smallest multiple-of-8 tile
    # that covers the batch, so padding waste is minimal (e.g. 300 -> 2x152,
    # not 2x256). Small batches collapse to a single tile.
    b8 = _round_up(max(batch, 8), 8)
    n_tiles = pl.cdiv(b8, tile_b)
    tile = _round_up(pl.cdiv(b8, n_tiles), 8)
    b_pad = tile * n_tiles
    grid = (n_tiles,)

    # Only the activation slab is padded per call (weights already prepared);
    # this pad fuses into the same XLA program under jit.
    x_p = jnp.zeros((b_pad, in_pad), jnp.float32).at[:batch, :in_dim].set(x)

    batch_map = lambda i: (i, 0)    # stream over batch tiles
    resident = lambda i: (0, 0)     # weights/biases stay put in VMEM

    flops = 2 * b_pad * (in_pad * hidden + 2 * hidden * hidden + hidden * out_pad)
    bytes_accessed = int(
        x_p.size * 4 + b_pad * out_pad * 4
        + sum(int(t.size) * t.dtype.itemsize for t in tensors))
    cost = pl.CostEstimate(flops=flops,
                           transcendentals=b_pad * out_pad,
                           bytes_accessed=bytes_accessed)

    out_p = pl.pallas_call(
        functools.partial(_actor_kernel, max_action=float(max_action)),
        out_shape=jax.ShapeDtypeStruct((b_pad, out_pad), jnp.float32),
        grid=grid,
        in_specs=[
            pl.BlockSpec((tile, in_pad), batch_map),
            pl.BlockSpec((in_pad, hidden), resident),
            pl.BlockSpec((1, hidden), resident),
            pl.BlockSpec((hidden, hidden), resident),
            pl.BlockSpec((1, hidden), resident),
            pl.BlockSpec((hidden, hidden), resident),
            pl.BlockSpec((1, hidden), resident),
            pl.BlockSpec((hidden, out_pad), resident),
            pl.BlockSpec((1, out_pad), resident),
        ],
        out_specs=pl.BlockSpec((tile, out_pad), batch_map),
        compiler_params=pltpu.CompilerParams(
            dimension_semantics=("parallel",)),
        cost_estimate=cost,
    )(x_p, *tensors)

    # Keep the padded lane-dense output inside the kernel; slice here (fused).
    return out_p[:batch, :act_dim]


def actor_forward(x, prepped, max_action, *, tile_b=256):
    """x: [batch, obs+goal] float32. Returns [batch, action] float32."""
    return _actor_forward_jit(
        x, prepped["tensors"],
        act_dim=int(prepped["act_dim"]),
        max_action=float(max_action),
        tile_b=int(tile_b))


def init_actor_params(key, in_dim, hidden, act_dim):
    """Deterministic init mimicking PyTorch nn.Linear default
    (uniform in [-1/sqrt(fan_in), 1/sqrt(fan_in)]). Weights stored (in, out)."""
    def linear(k, fan_in, fan_out):
        kw, kb = jax.random.split(k)
        bound = 1.0 / jnp.sqrt(fan_in)
        w = jax.random.uniform(kw, (fan_in, fan_out), jnp.float32, -bound, bound)
        b = jax.random.uniform(kb, (fan_out,), jnp.float32, -bound, bound)
        return w, b

    k1, k2, k3, k4 = jax.random.split(key, 4)
    return [
        linear(k1, in_dim, hidden),
        linear(k2, hidden, hidden),
        linear(k3, hidden, hidden),
        linear(k4, hidden, act_dim),
    ]


def _ref_forward(x, params, max_action):
    """Pure-JAX reference mimicking the kernel's bf16 matmul / f32 epilogue."""
    h = x
    for (w, b) in params[:-1]:
        h = jnp.dot(h.astype(jnp.bfloat16), w.astype(jnp.bfloat16),
                    preferred_element_type=jnp.float32) + b
        h = jnp.maximum(h, 0.0)
    w, b = params[-1]
    a = jnp.dot(h.astype(jnp.bfloat16), w.astype(jnp.bfloat16),
                preferred_element_type=jnp.float32) + b
    return max_action * jnp.tanh(a)


if __name__ == "__main__":
    # Small env_params consistent with the module: obs=10, goal=3, action=4.
    env_params = {"obs": 10, "goal": 3, "action": 4, "max_action": 1.0}
    in_dim = env_params["obs"] + env_params["goal"]
    hidden = 256

    key = jax.random.PRNGKey(0)
    kx, kp, kx2 = jax.random.split(key, 3)
    params = init_actor_params(kp, in_dim, hidden, env_params["action"])
    prepped = prepare_params(params)

    # Inference-sized batch (single tile path).
    batch = 2
    x = jax.random.normal(kx, (batch, in_dim), jnp.float32)
    actions = actor_forward(x, prepped, env_params["max_action"])
    actions = jax.block_until_ready(actions)

    expected = _ref_forward(x, params, env_params["max_action"])
    assert actions.shape == (batch, env_params["action"])
    assert jnp.allclose(actions, expected, atol=2e-3, rtol=2e-3)

    # Training-sized batch (multi-tile grid path, exercises batch streaming
    # with minimal padding: 300 rows -> 2 tiles of 152).
    batch2 = 300
    x2 = jax.random.normal(kx2, (batch2, in_dim), jnp.float32)
    actions2 = jax.block_until_ready(
        actor_forward(x2, prepped, env_params["max_action"]))
    expected2 = _ref_forward(x2, params, env_params["max_action"])
    assert actions2.shape == (batch2, env_params["action"])
    assert jnp.allclose(actions2, expected2, atol=2e-3, rtol=2e-3)

    print("KERNEL_OK")
</pallas_src>

<mosaic_0001>
module attributes {stable_mosaic.version = 11 : i64} {
  func.func @_actor_kernel(%arg0: i32, %arg1: memref<8x128xf32, #tpu.memory_space<vmem>>, %arg2: memref<128x256xbf16, #tpu.memory_space<vmem>>, %arg3: memref<1x256xf32, #tpu.memory_space<vmem>>, %arg4: memref<256x256xbf16, #tpu.memory_space<vmem>>, %arg5: memref<1x256xf32, #tpu.memory_space<vmem>>, %arg6: memref<256x256xbf16, #tpu.memory_space<vmem>>, %arg7: memref<1x256xf32, #tpu.memory_space<vmem>>, %arg8: memref<256x128xbf16, #tpu.memory_space<vmem>>, %arg9: memref<1x128xf32, #tpu.memory_space<vmem>>, %arg10: memref<8x128xf32, #tpu.memory_space<vmem>>) attributes {dimension_semantics = [#tpu.dimension_semantics<parallel>], iteration_bounds = array<i64: 1>, scalar_prefetch = 0 : i64, scratch_operands = 0 : i64, tpu.core_type = #tpu.core_type<tc>, window_params = [{transform_indices = @transform_0, window_bounds = array<i64: 8, 128>}, {pipeline_mode = #tpu.pipeline_mode<synchronous>, transform_indices = @transform_1, window_bounds = array<i64: 128, 256>}, {pipeline_mode = #tpu.pipeline_mode<synchronous>, transform_indices = @transform_2, window_bounds = array<i64: 1, 256>}, {pipeline_mode = #tpu.pipeline_mode<synchronous>, transform_indices = @transform_3, window_bounds = array<i64: 256, 256>}, {pipeline_mode = #tpu.pipeline_mode<synchronous>, transform_indices = @transform_4, window_bounds = array<i64: 1, 256>}, {pipeline_mode = #tpu.pipeline_mode<synchronous>, transform_indices = @transform_5, window_bounds = array<i64: 256, 256>}, {pipeline_mode = #tpu.pipeline_mode<synchronous>, transform_indices = @transform_6, window_bounds = array<i64: 1, 256>}, {pipeline_mode = #tpu.pipeline_mode<synchronous>, transform_indices = @transform_7, window_bounds = array<i64: 256, 128>}, {pipeline_mode = #tpu.pipeline_mode<synchronous>, transform_indices = @transform_8, window_bounds = array<i64: 1, 128>}, {transform_indices = @transform_9, window_bounds = array<i64: 8, 128>}]} {
    %c0 = arith.constant 0 : index
    %c0_0 = arith.constant 0 : index
    %0 = vector.load %arg1[%c0, %c0_0] : memref<8x128xf32, #tpu.memory_space<vmem>>, vector<8x128xf32>
    %1 = arith.truncf %0 : vector<8x128xf32> to vector<8x128xbf16>
    %c0_1 = arith.constant 0 : index
    %c0_2 = arith.constant 0 : index
    %2 = vector.load %arg2[%c0_1, %c0_2] : memref<128x256xbf16, #tpu.memory_space<vmem>>, vector<128x256xbf16>
    %cst = arith.constant dense<0.000000e+00> : vector<8x256xf32>
    %3 = tpu.matmul %1, %2, %cst {dimension_numbers = #tpu.dot_dimension_numbers<[1], [0], [0], [1], [0, 0, 1, 1], [], []>} : vector<8x128xbf16>, vector<128x256xbf16>, vector<8x256xf32> -> vector<8x256xf32>
    %c0_3 = arith.constant 0 : index
    %c0_4 = arith.constant 0 : index
    %4 = vector.load %arg3[%c0_3, %c0_4] : memref<1x256xf32, #tpu.memory_space<vmem>>, vector<1x256xf32>
    %5 = vector.broadcast %4 : vector<1x256xf32> to vector<8x256xf32>
    %6 = arith.addf %3, %5 : vector<8x256xf32>
    %cst_5 = arith.constant 0.000000e+00 : f32
    %7 = vector.broadcast %cst_5 : f32 to vector<8x256xf32>
    %8 = arith.maximumf %6, %7 : vector<8x256xf32>
    %9 = arith.truncf %8 : vector<8x256xf32> to vector<8x256xbf16>
    %c0_6 = arith.constant 0 : index
    %c0_7 = arith.constant 0 : index
    %10 = vector.load %arg4[%c0_6, %c0_7] : memref<256x256xbf16, #tpu.memory_space<vmem>>, vector<256x256xbf16>
    %cst_8 = arith.constant dense<0.000000e+00> : vector<8x256xf32>
    %11 = tpu.matmul %9, %10, %cst_8 {dimension_numbers = #tpu.dot_dimension_numbers<[1], [0], [0], [1], [0, 0, 1, 1], [], []>} : vector<8x256xbf16>, vector<256x256xbf16>, vector<8x256xf32> -> vector<8x256xf32>
    %c0_9 = arith.constant 0 : index
    %c0_10 = arith.constant 0 : index
    %12 = vector.load %arg5[%c0_9, %c0_10] : memref<1x256xf32, #tpu.memory_space<vmem>>, vector<1x256xf32>
    %13 = vector.broadcast %12 : vector<1x256xf32> to vector<8x256xf32>
    %14 = arith.addf %11, %13 : vector<8x256xf32>
    %cst_11 = arith.constant 0.000000e+00 : f32
    %15 = vector.broadcast %cst_11 : f32 to vector<8x256xf32>
    %16 = arith.maximumf %14, %15 : vector<8x256xf32>
    %17 = arith.truncf %16 : vector<8x256xf32> to vector<8x256xbf16>
    %c0_12 = arith.constant 0 : index
    %c0_13 = arith.constant 0 : index
    %18 = vector.load %arg6[%c0_12, %c0_13] : memref<256x256xbf16, #tpu.memory_space<vmem>>, vector<256x256xbf16>
    %cst_14 = arith.constant dense<0.000000e+00> : vector<8x256xf32>
    %19 = tpu.matmul %17, %18, %cst_14 {dimension_numbers = #tpu.dot_dimension_numbers<[1], [0], [0], [1], [0, 0, 1, 1], [], []>} : vector<8x256xbf16>, vector<256x256xbf16>, vector<8x256xf32> -> vector<8x256xf32>
    %c0_15 = arith.constant 0 : index
    %c0_16 = arith.constant 0 : index
    %20 = vector.load %arg7[%c0_15, %c0_16] : memref<1x256xf32, #tpu.memory_space<vmem>>, vector<1x256xf32>
    %21 = vector.broadcast %20 : vector<1x256xf32> to vector<8x256xf32>
    %22 = arith.addf %19, %21 : vector<8x256xf32>
    %cst_17 = arith.constant 0.000000e+00 : f32
    %23 = vector.broadcast %cst_17 : f32 to vector<8x256xf32>
    %24 = arith.maximumf %22, %23 : vector<8x256xf32>
    %25 = arith.truncf %24 : vector<8x256xf32> to vector<8x256xbf16>
    %c0_18 = arith.constant 0 : index
    %c0_19 = arith.constant 0 : index
    %26 = vector.load %arg8[%c0_18, %c0_19] : memref<256x128xbf16, #tpu.memory_space<vmem>>, vector<256x128xbf16>
    %cst_20 = arith.constant dense<0.000000e+00> : vector<8x128xf32>
    %27 = tpu.matmul %25, %26, %cst_20 {dimension_numbers = #tpu.dot_dimension_numbers<[1], [0], [0], [1], [0, 0, 1, 1], [], []>} : vector<8x256xbf16>, vector<256x128xbf16>, vector<8x128xf32> -> vector<8x128xf32>
    %c0_21 = arith.constant 0 : index
    %c0_22 = arith.constant 0 : index
    %28 = vector.load %arg9[%c0_21, %c0_22] : memref<1x128xf32, #tpu.memory_space<vmem>>, vector<1x128xf32>
    %29 = vector.broadcast %28 : vector<1x128xf32> to vector<8x128xf32>
    %30 = arith.addf %27, %29 : vector<8x128xf32>
    %31 = math.tanh %30 : vector<8x128xf32>
    %c0_23 = arith.constant 0 : index
    %c0_24 = arith.constant 0 : index
    %32 = vector.load %arg10[%c0_23, %c0_24] : memref<8x128xf32, #tpu.memory_space<vmem>>, vector<8x128xf32>
    tpu.vector_store %arg10[%c0_23, %c0_24], %31 {strides = array<i32>} : memref<8x128xf32, #tpu.memory_space<vmem>>, vector<8x128xf32>,
    return
  }
  func.func @transform_0(%arg0: i32) -> (i32, i32) {
    %c0_i32 = arith.constant 0 : i32
    %c0_i32_0 = arith.constant 0 : i32
    return %arg0, %c0_i32 : i32, i32
  }
  func.func @transform_1(%arg0: i32) -> (i32, i32) {
    %c0_i32 = arith.constant 0 : i32
    %c0_i32_0 = arith.constant 0 : i32
    %c0_i32_1 = arith.constant 0 : i32
    return %c0_i32, %c0_i32_0 : i32, i32
  }
  func.func @transform_2(%arg0: i32) -> (i32, i32) {
    %c0_i32 = arith.constant 0 : i32
    %c0_i32_0 = arith.constant 0 : i32
    %c0_i32_1 = arith.constant 0 : i32
    return %c0_i32, %c0_i32_0 : i32, i32
  }
  func.func @transform_3(%arg0: i32) -> (i32, i32) {
    %c0_i32 = arith.constant 0 : i32
    %c0_i32_0 = arith.constant 0 : i32
    %c0_i32_1 = arith.constant 0 : i32
    return %c0_i32, %c0_i32_0 : i32, i32
  }
  func.func @transform_4(%arg0: i32) -> (i32, i32) {
    %c0_i32 = arith.constant 0 : i32
    %c0_i32_0 = arith.constant 0 : i32
    %c0_i32_1 = arith.constant 0 : i32
    return %c0_i32, %c0_i32_0 : i32, i32
  }
  func.func @transform_5(%arg0: i32) -> (i32, i32) {
    %c0_i32 = arith.constant 0 : i32
    %c0_i32_0 = arith.constant 0 : i32
    %c0_i32_1 = arith.constant 0 : i32
    return %c0_i32, %c0_i32_0 : i32, i32
  }
  func.func @transform_6(%arg0: i32) -> (i32, i32) {
    %c0_i32 = arith.constant 0 : i32
    %c0_i32_0 = arith.constant 0 : i32
    %c0_i32_1 = arith.constant 0 : i32
    return %c0_i32, %c0_i32_0 : i32, i32
  }
  func.func @transform_7(%arg0: i32) -> (i32, i32) {
    %c0_i32 = arith.constant 0 : i32
    %c0_i32_0 = arith.constant 0 : i32
    %c0_i32_1 = arith.constant 0 : i32
    return %c0_i32, %c0_i32_0 : i32, i32
  }
  func.func @transform_8(%arg0: i32) -> (i32, i32) {
    %c0_i32 = arith.constant 0 : i32
    %c0_i32_0 = arith.constant 0 : i32
    %c0_i32_1 = arith.constant 0 : i32
    return %c0_i32, %c0_i32_0 : i32, i32
  }
  func.func @transform_9(%arg0: i32) -> (i32, i32) {
    %c0_i32 = arith.constant 0 : i32
    %c0_i32_0 = arith.constant 0 : i32
    return %arg0, %c0_i32 : i32, i32
  }
}

</mosaic_0001>

<bundles_post_ra>
// kernel: _actor_forward_jit.1
= control target key start
LH: loop header
LB: loop body
LE: loop exit
PB: predicated region body
PF: predicated region fallthrough
CT: control target
= control target key end

     0   :  { %14 = vsyncpa [#allocation3], 0  ;;  %s1443_s0 = inlined_call_operand.vmem [shape: f32[8,128], index: 0, kind: input, shape index: {}]   ;;  %s1444_s1 = inlined_call_operand.hbm [shape: bf16[128,256], index: 1, kind: input, shape index: {}]   ;;  %s1445_s2 = inlined_call_operand.vmem [shape: f32[1,256], index: 2, kind: input, shape index: {}]   ;;  %s1446_s3 = inlined_call_operand.hbm [shape: bf16[256,256], index: 3, kind: input, shape index: {}]   ;;  %s1447_s4 = inlined_call_operand.vmem [shape: f32[1,256], index: 4, kind: input, shape index: {}]   ;;  %s1448_s5 = inlined_call_operand.hbm [shape: bf16[256,256], index: 5, kind: input, shape index: {}]   ;;  %s1449_s6 = inlined_call_operand.vmem [shape: f32[1,256], index: 6, kind: input, shape index: {}]   ;;  %s1450_s7 = inlined_call_operand.hbm [shape: bf16[256,128], index: 7, kind: input, shape index: {}]   ;;  %s1451_s8 = inlined_call_operand.vmem [shape: f32[1,128], index: 8, kind: input, shape index: {}]   ;;  %s1452_s9 = inlined_call_operand.vmem [shape: f32[8,128], index: 9, kind: output, shape index: {}]  }
   0x1   :  { %15 = vsyncpa [#allocation5], 0 }
   0x2   :  { %16 = vsyncpa [#allocation8], 0  ;;  %s1285_s30 = smov [#allocation4]   ;;  %s1286_s11 = smov [#allocation2]  }
   0x3   :  { %s38_s10 = sshll.u32 %s1285_s30, 4  ;;  %s24_s12 = sshll.u32 %s1286_s11, 4  ;;  %s39_s10 = int_to_ptr.vmem [resolvable:$true] %s38_s10  ;;  %s1344_s12 = int_to_ptr.vmem [resolvable:$true] %s24_s12 }
   0x4   :  { %s1191_s15 = scalar_lea.hbm %s1446_s3, 4096 }
   0x5   :  { %p1192_p0 = scmp.ne.s32.totalorder %s1446_s3, %s1191_s15  ;;  %p1195_p1 = scmp.lt.u32.totalorder %s1191_s15, %s1446_s3 }
   0x7   :  { %p1197_p2 = pnand %p1195_p1, %p1192_p0 }
   0x9   :  { %1200 = shalt.err (!%p1197_p2)
}
   0xa   :  { %s1201_s20 = scalar_lea.vmem %s39_s10, 4096  ;;  %p1206_p4 = scmp.lt.s32.totalorder %s39_s10, %s39_s10 }
   0xb   :  { %p1202_p3 = scmp.ne.s32.totalorder %s39_s10, %s1201_s20  ;;  %p1207_p5 = scmp.lt.s32.totalorder %s1201_s20, %s1201_s20 }
   0xd   :  { %p1208_p6 = por %p1207_p5, %p1206_p4 }
   0xf   :  { %p1209_p7 = pnand %p1208_p6, %p1202_p3 }
  0x11   :  { %1212 = shalt.err (!%p1209_p7)
}
  0x12   :  { %s1287_s21 = smov 128   ;;  %s1288_s22 = smov 8  }
  0x13   :  { %44 = dma.hbm_to_vmem [thread:$0]  %s1446_s3, 4096, %s39_s10, [#allocation5], %s1287_s21, %s1287_s21, %s1288_s22  }
  0x14   :  { %s1213_s27 = scalar_lea.hbm %s1444_s1, 2048 }
  0x15   :  { %p1214_p8 = scmp.ne.s32.totalorder %s1444_s1, %s1213_s27  ;;  %p1217_p9 = scmp.lt.u32.totalorder %s1213_s27, %s1444_s1 }
  0x17   :  { %p1219_p10 = pnand %p1217_p9, %p1214_p8 }
  0x19   :  { %1222 = shalt.err (!%p1219_p10)
}
  0x1a   :  { %s1223_s13 = scalar_lea.vmem %s1344_s12, 2048  ;;  %p1228_p12 = scmp.lt.s32.totalorder %s1344_s12, %s1344_s12 }
  0x1b   :  { %p1224_p11 = scmp.ne.s32.totalorder %s1344_s12, %s1223_s13  ;;  %p1229_p13 = scmp.lt.s32.totalorder %s1223_s13, %s1223_s13 }
  0x1d   :  { %p1230_p0 = por %p1229_p13, %p1228_p12 }
  0x1f   :  { %p1231_p1 = pnand %p1230_p0, %p1224_p11 }
  0x21   :  { %1234 = shalt.err (!%p1231_p1)
}
  0x22   :  { %30 = dma.hbm_to_vmem [thread:$0]  %s1444_s1, 2048, %s1344_s12, [#allocation3], %s1287_s21, %s1287_s21, %s1288_s22  }
  0x23   :  { %s1289_s14 = smov [#allocation6]   ;;  %s1290_s16 = smov [#allocation7]  }
  0x24   :  { %s52_s15 = sshll.u32 %s1289_s14, 4  ;;  %s66_s17 = sshll.u32 %s1290_s16, 4  ;;  %s53_s15 = int_to_ptr.vmem [resolvable:$true] %s52_s15  ;;  %s1381_s17 = int_to_ptr.vmem [resolvable:$true] %s66_s17 }
  0x25   :  { %s1235_s20 = scalar_lea.hbm %s1448_s5, 4096 }
  0x26   :  { %p1236_p2 = scmp.ne.s32.totalorder %s1448_s5, %s1235_s20  ;;  %p1239_p3 = scmp.lt.u32.totalorder %s1235_s20, %s1448_s5 }
  0x28   :  { %p1241_p4 = pnand %p1239_p3, %p1236_p2 }
  0x2a   :  { %1244 = shalt.err (!%p1241_p4)
}
  0x2b   :  { %s1245_s1 = scalar_lea.vmem %s53_s15, 4096  ;;  %p1250_p6 = scmp.lt.s32.totalorder %s53_s15, %s53_s15 }
  0x2c   :  { %p1246_p5 = scmp.ne.s32.totalorder %s53_s15, %s1245_s1  ;;  %p1251_p7 = scmp.lt.s32.totalorder %s1245_s1, %s1245_s1 }
  0x2e   :  { %p1252_p8 = por %p1251_p7, %p1250_p6 }
  0x30   :  { %p1253_p9 = pnand %p1252_p8, %p1246_p5 }
  0x32   :  { %1256 = shalt.err (!%p1253_p9)
}
  0x33   :  { %58 = dma.hbm_to_vmem [thread:$0]  %s1448_s5, 4096, %s53_s15, [#allocation5], %s1287_s21, %s1287_s21, %s1288_s22  }
  0x34   :  { %s1257_s30 = scalar_lea.hbm %s1450_s7, 2048 }
  0x35   :  { %p1258_p10 = scmp.ne.s32.totalorder %s1450_s7, %s1257_s30  ;;  %p1261_p11 = scmp.lt.u32.totalorder %s1257_s30, %s1450_s7 }
  0x37   :  { %p1263_p12 = pnand %p1261_p11, %p1258_p10 }
  0x39   :  { %1266 = shalt.err (!%p1263_p12)
}
  0x3a   :  { %s1267_s14 = scalar_lea.vmem %s1381_s17, 2048  ;;  %p1272_p0 = scmp.lt.s32.totalorder %s1381_s17, %s1381_s17 }
  0x3b   :  { %p1268_p13 = scmp.ne.s32.totalorder %s1381_s17, %s1267_s14  ;;  %p1273_p1 = scmp.lt.s32.totalorder %s1267_s14, %s1267_s14 }
  0x3d   :  { %p1274_p2 = por %p1273_p1, %p1272_p0 }
  0x3f   :  { %p1275_p3 = pnand %p1274_p2, %p1268_p13 }
  0x41   :  { %1278 = shalt.err (!%p1275_p3)
}
  0x42   :  { %s1291_s5 = smov 64   ;;  %s1292_s21 = smov 4  }
  0x43   :  { %72 = dma.hbm_to_vmem [thread:$0]  %s1450_s7, 2048, %s1381_s17, [#allocation8], %s1291_s5, %s1291_s5, %s1292_s21  }
  0x44   :  { %1279 = dma.done.wait [#allocation3], 2048  }
  0x45   :  { %1280 = vsyncadd [#allocation3], 4294965248 }
  0x46   :  { %1281 = dma.done.wait [#allocation5], 8192  }
  0x47   :  { %1282 = vsyncadd [#allocation5], 4294959104 }
  0x48   :  { %1283 = dma.done.wait [#allocation8], 2048  }
  0x49   :  { %1284 = vsyncadd [#allocation8], 4294965248  ;;  %v1293_v0 = vmov 0   ;;  %v1053_v1 = vld [vmem:[#allocation2 + $0x4] ss:$8 sps:$4 sm:$0xff]  }
  0x4a   :  { %230 = vmatprep.mubr.bf16.mxu0 %v1293_v0  ;;  %v1055_v2 = vld [vmem:[#allocation2] ss:$8 sps:$4 sm:$0xff]   ;;  %198 = vmatprep.subr.bf16.mxu0 %v1053_v1  ;;  %v1056_v3 = vld [vmem:[#allocation2 + $0x14] ss:$8 sps:$4 sm:$0xff]   ;;  %v1058_v4 = vld [vmem:[#allocation2 + $0x10] ss:$8 sps:$4 sm:$0xff]  }
  0x4b   :  { %199 = vmatpush1.bf16.msra.mxu0 %v1055_v2  ;;  %v1059_v5 = vld [vmem:[#allocation2 + $0x24] ss:$8 sps:$4 sm:$0xff]   ;;  %v1061_v6 = vld [vmem:[#allocation2 + $0x20] ss:$8 sps:$4 sm:$0xff]   ;;  %v1062_v7 = vld [vmem:[#allocation2 + $0x34] ss:$8 sps:$4 sm:$0xff]  }
  0x4c   :  { %200 = vmatprep.subr.bf16.mxu0 %v1056_v3  ;;  %v1064_v8 = vld [vmem:[#allocation2 + $0x30] ss:$8 sps:$4 sm:$0xff]   ;;  %v1065_v9 = vld [vmem:[#allocation2 + $0x44] ss:$8 sps:$4 sm:$0xff]   ;;  %v1079_v11 = vld [vmem:[#allocation4] ss:$8 sps:$4 sm:$0xff]  }
  0x4d   :  { %v1077_v10 = vld [vmem:[#allocation4 + $0x4] ss:$8 sps:$4 sm:$0xff]   ;;  %v1080_v12 = vld [vmem:[#allocation4 + $0x14] ss:$8 sps:$4 sm:$0xff]   ;;  %v1067_v13 = vld [vmem:[#allocation2 + $0x40] ss:$8 sps:$4 sm:$0xff]  }
  0x4e   :  { %447 = vmatprep.subr.bf16.mxu1 %v1077_v10  ;;  %v1082_v14 = vld [vmem:[#allocation4 + $0x10] ss:$8 sps:$4 sm:$0xff]   ;;  %v1083_v15 = vld [vmem:[#allocation4 + $0x24] ss:$8 sps:$4 sm:$0xff]   ;;  %v1068_v16 = vld [vmem:[#allocation2 + $0x54] ss:$8 sps:$4 sm:$0xff]  }
  0x4f   :  { %201 = vmatpush1.bf16.msra.mxu0 %v1058_v4  ;;  %448 = vmatpush1.bf16.msra.mxu1 %v1079_v11  ;;  %v1070_v17 = vld [vmem:[#allocation2 + $0x50] ss:$8 sps:$4 sm:$0xff]   ;;  %v1085_v18 = vld [vmem:[#allocation4 + $0x20] ss:$8 sps:$4 sm:$0xff]   ;;  %v1086_v19 = vld [vmem:[#allocation4 + $0x34] ss:$8 sps:$4 sm:$0xff]  }
  0x50   :  { %202 = vmatprep.subr.bf16.mxu0 %v1059_v5  ;;  %449 = vmatprep.subr.bf16.mxu1 %v1080_v12  ;;  %v1071_v20 = vld [vmem:[#allocation2 + $0x64] ss:$8 sps:$4 sm:$0xff]   ;;  %v1073_v21 = vld [vmem:[#allocation2 + $0x60] ss:$8 sps:$4 sm:$0xff]   ;;  %v1088_v22 = vld [vmem:[#allocation4 + $0x30] ss:$8 sps:$4 sm:$0xff]  }
  0x51   :  { %v1089_v23 = vld [vmem:[#allocation4 + $0x44] ss:$8 sps:$4 sm:$0xff]   ;;  %v1074_v24 = vld [vmem:[#allocation2 + $0x74] ss:$8 sps:$4 sm:$0xff]   ;;  %v1076_v25 = vld [vmem:[#allocation2 + $0x70] ss:$8 sps:$4 sm:$0xff]  }
  0x52   :  { %v88_v26 = vld [vmem:[%s1443_s0] sm:$0xff]  ;;  %v1092_v28 = vld [vmem:[#allocation4 + $0x54] ss:$8 sps:$4 sm:$0xff]   ;;  %v1094_v29 = vld [vmem:[#allocation4 + $0x50] ss:$8 sps:$4 sm:$0xff]  }
  0x53   :  { %203 = vmatpush1.bf16.msra.mxu0 %v1061_v6  ;;  %450 = vmatpush1.bf16.msra.mxu1 %v1082_v14  ;;  %v1091_v27 = vld [vmem:[#allocation4 + $0x40] ss:$8 sps:$4 sm:$0xff]   ;;  %v1095_v30 = vld [vmem:[#allocation4 + $0x64] ss:$8 sps:$4 sm:$0xff]   ;;  %v89_v31 = vpack.c.bf16 %v88_v26, %v88_v26  ;;  %v1098_v33 = vld [vmem:[#allocation4 + $0x74] ss:$8 sps:$4 sm:$0xff]  }
  0x54   :  { %204 = vmatprep.subr.bf16.mxu0 %v1062_v7  ;;  %451 = vmatprep.subr.bf16.mxu1 %v1083_v15  ;;  %v1097_v32 = vld [vmem:[#allocation4 + $0x60] ss:$8 sps:$4 sm:$0xff]   ;;  %v1100_v34 = vld [vmem:[#allocation4 + $0x70] ss:$8 sps:$4 sm:$0xff]   ;;  %v1101_v35 = vld [vmem:[#allocation4 + $0x84] ss:$8 sps:$4 sm:$0xff]   ;;  %v108_v15 = vlaneseq }
  0x55   :  { %v1103_v36 = vld [vmem:[#allocation4 + $0x80] ss:$8 sps:$4 sm:$0xff]   ;;  %v1104_v37 = vld [vmem:[#allocation4 + $0x94] ss:$8 sps:$4 sm:$0xff]   ;;  %v1106_v38 = vld [vmem:[#allocation4 + $0x90] ss:$8 sps:$4 sm:$0xff]  }
  0x56   :  { %v1107_v39 = vld [vmem:[#allocation4 + $0xa4] ss:$8 sps:$4 sm:$0xff]   ;;  %v1109_v40 = vld [vmem:[#allocation4 + $0xa0] ss:$8 sps:$4 sm:$0xff]   ;;  %v1110_v41 = vld [vmem:[#allocation4 + $0xb4] ss:$8 sps:$4 sm:$0xff]  }
  0x57   :  { %205 = vmatpush1.bf16.msra.mxu0 %v1064_v8  ;;  %452 = vmatpush1.bf16.msra.mxu1 %v1085_v18  ;;  %v1112_v42 = vld [vmem:[#allocation4 + $0xb0] ss:$8 sps:$4 sm:$0xff]   ;;  %v1113_v43 = vld [vmem:[#allocation4 + $0xc4] ss:$8 sps:$4 sm:$0xff]   ;;  %v1115_v44 = vld [vmem:[#allocation4 + $0xc0] ss:$8 sps:$4 sm:$0xff]  }
  0x58   :  { %206 = vmatprep.subr.bf16.mxu0 %v1065_v9  ;;  %453 = vmatprep.subr.bf16.mxu1 %v1086_v19  ;;  %v1116_v45 = vld [vmem:[#allocation4 + $0xd4] ss:$8 sps:$4 sm:$0xff]   ;;  %v1118_v46 = vld [vmem:[#allocation4 + $0xd0] ss:$8 sps:$4 sm:$0xff]   ;;  %v1119_v47 = vld [vmem:[#allocation4 + $0xe4] ss:$8 sps:$4 sm:$0xff]  }
  0x59   :  { %v1121_v48 = vld [vmem:[#allocation4 + $0xe0] ss:$8 sps:$4 sm:$0xff]   ;;  %v1122_v49 = vld [vmem:[#allocation4 + $0xf4] ss:$8 sps:$4 sm:$0xff]   ;;  %v1124_v50 = vld [vmem:[#allocation4 + $0xf0] ss:$8 sps:$4 sm:$0xff]  }
  0x5a   :  { %v1125_v51 = vld [vmem:[#allocation6] ss:$8 sps:$4 sm:$0xff]   ;;  %v1127_v52 = vld [vmem:[#allocation6 + $0x4] ss:$8 sps:$4 sm:$0xff]   ;;  %v1130_v53 = vld [vmem:[#allocation6 + $0x14] ss:$8 sps:$4 sm:$0xff]  }
  0x5b   :  { %207 = vmatpush1.bf16.msra.mxu0 %v1067_v13  ;;  %454 = vmatpush1.bf16.msra.mxu1 %v1088_v22  ;;  %v1128_v54 = vld [vmem:[#allocation6 + $0x10] ss:$8 sps:$4 sm:$0xff]   ;;  %v1133_v55 = vld [vmem:[#allocation6 + $0x24] ss:$8 sps:$4 sm:$0xff]   ;;  %v1131_v56 = vld [vmem:[#allocation6 + $0x20] ss:$8 sps:$4 sm:$0xff]  }
  0x5c   :  { %208 = vmatprep.subr.bf16.mxu0 %v1068_v16  ;;  %455 = vmatprep.subr.bf16.mxu1 %v1089_v23  ;;  %v1136_v57 = vld [vmem:[#allocation6 + $0x34] ss:$8 sps:$4 sm:$0xff]   ;;  %v1134_v58 = vld [vmem:[#allocation6 + $0x30] ss:$8 sps:$4 sm:$0xff]   ;;  %v1139_v59 = vld [vmem:[#allocation6 + $0x44] ss:$8 sps:$4 sm:$0xff]  }
  0x5d   :  { %v1137_v60 = vld [vmem:[#allocation6 + $0x40] ss:$8 sps:$4 sm:$0xff]   ;;  %v1142_v61 = vld [vmem:[#allocation6 + $0x54] ss:$8 sps:$4 sm:$0xff]   ;;  %v1140_v62 = vld [vmem:[#allocation6 + $0x50] ss:$8 sps:$4 sm:$0xff]  }
  0x5e   :  { %v1145_v63 = vld [vmem:[#allocation6 + $0x64] ss:$8 sps:$4 sm:$0xff]   ;;  %v1143_v0 = vld [vmem:[#allocation6 + $0x60] ss:$8 sps:$4 sm:$0xff]   ;;  %v1148_v1 = vld [vmem:[#allocation6 + $0x74] ss:$8 sps:$4 sm:$0xff]  }
  0x5f   :  { %209 = vmatpush1.bf16.msra.mxu0 %v1070_v17  ;;  %456 = vmatpush1.bf16.msra.mxu1 %v1091_v27  ;;  %v1146_v2 = vld [vmem:[#allocation6 + $0x70] ss:$8 sps:$4 sm:$0xff]   ;;  %v1151_v3 = vld [vmem:[#allocation6 + $0x84] ss:$8 sps:$4 sm:$0xff]   ;;  %v1149_v4 = vld [vmem:[#allocation6 + $0x80] ss:$8 sps:$4 sm:$0xff]  }
  0x60   :  { %210 = vmatprep.subr.bf16.mxu0 %v1071_v20  ;;  %457 = vmatprep.subr.bf16.mxu1 %v1092_v28  ;;  %v1154_v5 = vld [vmem:[#allocation6 + $0x94] ss:$8 sps:$4 sm:$0xff]   ;;  %v1152_v6 = vld [vmem:[#allocation6 + $0x90] ss:$8 sps:$4 sm:$0xff]   ;;  %v1157_v7 = vld [vmem:[#allocation6 + $0xa4] ss:$8 sps:$4 sm:$0xff]  }
  0x61   :  { %v1155_v8 = vld [vmem:[#allocation6 + $0xa0] ss:$8 sps:$4 sm:$0xff]   ;;  %v1160_v9 = vld [vmem:[#allocation6 + $0xb4] ss:$8 sps:$4 sm:$0xff]   ;;  %v1158_v10 = vld [vmem:[#allocation6 + $0xb0] ss:$8 sps:$4 sm:$0xff]  }
  0x62   :  { %v1163_v11 = vld [vmem:[#allocation6 + $0xc4] ss:$8 sps:$4 sm:$0xff]   ;;  %v1161_v12 = vld [vmem:[#allocation6 + $0xc0] ss:$8 sps:$4 sm:$0xff]   ;;  %v1166_v13 = vld [vmem:[#allocation6 + $0xd4] ss:$8 sps:$4 sm:$0xff]  }
  0x63   :  { %211 = vmatpush1.bf16.msra.mxu0 %v1073_v21  ;;  %458 = vmatpush1.bf16.msra.mxu1 %v1094_v29  ;;  %v1164_v14 = vld [vmem:[#allocation6 + $0xd0] ss:$8 sps:$4 sm:$0xff]   ;;  %v109_v16 = vshrl.u32 %v108_v15, 7  ;;  %v106_v18 = vld [vmem:[%s1445_s2] sm:$0x3] }
  0x64   :  { %212 = vmatprep.subr.bf16.mxu0 %v1074_v24  ;;  %459 = vmatprep.subr.bf16.mxu1 %v1095_v30  ;;  %v1005_v15 = vld [vmem:[%s1451_s8] ss:$0 sm:$0xff] }
  0x65   :  { %v1418_v17 = vsub.s32 0, %v109_v16  ;;  %v1423_v19 = vsub.s32 1, %v109_v16 }
  0x67   :  { %213 = vmatpush1.bf16.msra.mxu0 %v1076_v25  ;;  %460 = vmatpush1.bf16.msra.mxu1 %v1097_v32  ;;  %v111_v20 = vrot.slane %v106_v18, %v1418_v17  ;;  %v115_v21 = vrot.slane %v106_v18, %v1423_v19  ;;  %v1169_v32 = vld [vmem:[#allocation6 + $0xe4] ss:$8 sps:$4 sm:$0xff]  }
  0x68   :  { %461 = vmatprep.subr.bf16.mxu1 %v1098_v33  ;;  %696 = vmatprep.subr.bf16.mxu0 %v1127_v52  ;;  %v1167_v33 = vld [vmem:[#allocation6 + $0xe0] ss:$8 sps:$4 sm:$0xff]  }
  0x6a   :  { %231 = vmatmul.mubr.bf16.vlgmr.msra.gmra.mrb[0].mxu0 %v89_v31 }
  0x6b   :  { %462 = vmatpush1.bf16.msra.mxu1 %v1100_v34  ;;  %697 = vmatpush1.bf16.msra.mxu0 %v1125_v51  ;;  %v1172_v34 = vld [vmem:[#allocation6 + $0xf4] ss:$8 sps:$4 sm:$0xff]  }
  0x6c   :  { %463 = vmatprep.subr.bf16.mxu1 %v1101_v35  ;;  %698 = vmatprep.subr.bf16.mxu0 %v1130_v53  ;;  %v1170_v35 = vld [vmem:[#allocation6 + $0xf0] ss:$8 sps:$4 sm:$0xff]  }
  0x6f   :  { %464 = vmatpush1.bf16.msra.mxu1 %v1103_v36  ;;  %699 = vmatpush1.bf16.msra.mxu0 %v1128_v54  ;;  %v1173_v36 = vld [vmem:[#allocation7 + $0x40] sm:$0xff]  }
  0x70   :  { %465 = vmatprep.subr.bf16.mxu1 %v1104_v37  ;;  %700 = vmatprep.subr.bf16.mxu0 %v1133_v55  ;;  %v1174_v37 = vld [vmem:[#allocation7] sm:$0xff]  }
  0x73   :  { %466 = vmatpush1.bf16.msra.mxu1 %v1106_v38  ;;  %701 = vmatpush1.bf16.msra.mxu0 %v1131_v56  ;;  %v1175_v38 = vld [vmem:[#allocation7 + $0x48] sm:$0xff]  }
  0x74   :  { %467 = vmatprep.subr.bf16.mxu1 %v1107_v39  ;;  %702 = vmatprep.subr.bf16.mxu0 %v1136_v57  ;;  %v1176_v39 = vld [vmem:[#allocation7 + $0x8] sm:$0xff]  }
  0x77   :  { %468 = vmatpush1.bf16.msra.mxu1 %v1109_v40  ;;  %703 = vmatpush1.bf16.msra.mxu0 %v1134_v58  ;;  %v1177_v40 = vld [vmem:[#allocation7 + $0x50] sm:$0xff]  }
  0x78   :  { %469 = vmatprep.subr.bf16.mxu1 %v1110_v41  ;;  %704 = vmatprep.subr.bf16.mxu0 %v1139_v59  ;;  %v1178_v41 = vld [vmem:[#allocation7 + $0x10] sm:$0xff]  }
  0x7b   :  { %470 = vmatpush1.bf16.msra.mxu1 %v1112_v42  ;;  %705 = vmatpush1.bf16.msra.mxu0 %v1137_v60  ;;  %v1179_v42 = vld [vmem:[#allocation7 + $0x58] sm:$0xff]  }
  0x7c   :  { %471 = vmatprep.subr.bf16.mxu1 %v1113_v43  ;;  %706 = vmatprep.subr.bf16.mxu0 %v1142_v61  ;;  %v1180_v43 = vld [vmem:[#allocation7 + $0x18] sm:$0xff]   ;;  %v1185_v61 = vld [vmem:[#allocation7 + $0x70] sm:$0xff]  }
  0x7f   :  { %472 = vmatpush1.bf16.msra.mxu1 %v1115_v44  ;;  %707 = vmatpush1.bf16.msra.mxu0 %v1140_v62  ;;  %v1181_v44 = vld [vmem:[#allocation7 + $0x60] sm:$0xff]   ;;  %v1186_v62 = vld [vmem:[#allocation7 + $0x30] sm:$0xff]  }
  0x80   :  { %473 = vmatprep.subr.bf16.mxu1 %v1116_v45  ;;  %708 = vmatprep.subr.bf16.mxu0 %v1145_v63  ;;  %v1182_v45 = vld [vmem:[#allocation7 + $0x20] sm:$0xff]   ;;  %v1187_v63 = vld [vmem:[#allocation7 + $0x78] sm:$0xff]  }
  0x83   :  { %474 = vmatpush1.bf16.msra.mxu1 %v1118_v46  ;;  %709 = vmatpush1.bf16.msra.mxu0 %v1143_v0  ;;  %v1183_v46 = vld [vmem:[#allocation7 + $0x68] sm:$0xff]   ;;  %v1188_v0 = vld [vmem:[#allocation7 + $0x38] sm:$0xff]  }
  0x84   :  { %475 = vmatprep.subr.bf16.mxu1 %v1119_v47  ;;  %710 = vmatprep.subr.bf16.mxu0 %v1148_v1  ;;  %v1184_v47 = vld [vmem:[#allocation7 + $0x28] sm:$0xff]   ;;  %v524_v1 = vld [vmem:[%s1449_s6] sm:$0x3] }
  0x87   :  { %476 = vmatpush1.bf16.msra.mxu1 %v1121_v48  ;;  %711 = vmatpush1.bf16.msra.mxu0 %v1146_v2  ;;  %v275_v48 = vld [vmem:[%s1447_s4] sm:$0x3]  ;;  %v529_v2 = vrot.slane %v524_v1, %v1418_v17 }
  0x88   :  { %477 = vmatprep.subr.bf16.mxu1 %v1122_v49  ;;  %712 = vmatprep.subr.bf16.mxu0 %v1151_v3  ;;  %v280_v49 = vrot.slane %v275_v48, %v1418_v17  ;;  %v533_v3 = vrot.slane %v524_v1, %v1423_v19 }
  0x8b   :  { %478 = vmatpush1.bf16.msra.mxu1 %v1124_v50  ;;  %713 = vmatpush1.bf16.msra.mxu0 %v1149_v4  ;;  %v284_v50 = vrot.slane %v275_v48, %v1423_v19 }
  0x8c   :  { %714 = vmatprep.subr.bf16.mxu0 %v1154_v5  ;;  %1022 = vmatprep.subr.bf16.mxu1 %v1173_v36 }
  0x8f   :  { %715 = vmatpush1.bf16.msra.mxu0 %v1152_v6 }
  0x90   :  { %716 = vmatprep.subr.bf16.mxu0 %v1157_v7 }
  0x93   :  { %717 = vmatpush1.bf16.msra.mxu0 %v1155_v8 }
  0x94   :  { %718 = vmatprep.subr.bf16.mxu0 %v1160_v9 }
  0x97   :  { %719 = vmatpush1.bf16.msra.mxu0 %v1158_v10 }
  0x98   :  { %720 = vmatprep.subr.bf16.mxu0 %v1163_v11 }
  0x9b   :  { %721 = vmatpush1.bf16.msra.mxu0 %v1161_v12 }
  0x9c   :  { %722 = vmatprep.subr.bf16.mxu0 %v1166_v13 }
  0x9f   :  { %723 = vmatpush1.bf16.msra.mxu0 %v1164_v14 }
  0xa0   :  { %724 = vmatprep.subr.bf16.mxu0 %v1169_v32 }
  0xa3   :  { %725 = vmatpush1.bf16.msra.mxu0 %v1167_v33 }
  0xa4   :  { %726 = vmatprep.subr.bf16.mxu0 %v1172_v34 }
  0xa7   :  { %727 = vmatpush1.bf16.msra.mxu0 %v1170_v35 }
 0x13d   :  { %v232_v22 = vpop.f32.mrb[0].mxu0 }
 0x13e   :  { %v233_v23 = vadd.f32 %v232_v22, %v111_v20  ;;  %v234_v24 = vpop.f32.mrb[1].mxu0 }
 0x13f   :  { %v235_v25 = vadd.f32 %v234_v24, %v115_v21  ;;  %v236_v26 = vpop.f32.mrb[2].mxu0 }
 0x140   :  { %v239_v27 = vmax.f32 %v233_v23, 0.0  ;;  %v237_v28 = vpop.f32.mrb[3].mxu0 }
 0x141   :  { %v240_v29 = vmax.f32 %v235_v25, 0.0 }
 0x142   :  { %v241_v31 = vpack.c.bf16 %v239_v27, %v239_v27 }
 0x143   :  { %v242_v30 = vpack.c.bf16 %v240_v29, %v240_v29 }
 0x145   :  { %479 = vmatprep.mubr.bf16.mxu1 %v242_v30 }
 0x146   :  { %480 = vmatmul.mubr.bf16.vlgmr.msra.gmra.mrb[0].mxu1 %v241_v31 }
 0x147   :  { %1023 = vmatpush3.bf16.msra.mxu1 %v1174_v37 }
 0x148   :  { %1024 = vmatprep.subr.bf16.mxu1 %v1175_v38 }
 0x14b   :  { %1025 = vmatpush3.bf16.msra.mxu1 %v1176_v39 }
 0x14c   :  { %1026 = vmatprep.subr.bf16.mxu1 %v1177_v40 }
 0x14f   :  { %1027 = vmatpush3.bf16.msra.mxu1 %v1178_v41 }
 0x150   :  { %1028 = vmatprep.subr.bf16.mxu1 %v1179_v42 }
 0x153   :  { %1029 = vmatpush3.bf16.msra.mxu1 %v1180_v43 }
 0x154   :  { %1030 = vmatprep.subr.bf16.mxu1 %v1181_v44 }
 0x157   :  { %1031 = vmatpush3.bf16.msra.mxu1 %v1182_v45 }
 0x158   :  { %1032 = vmatprep.subr.bf16.mxu1 %v1183_v46 }
 0x15b   :  { %1033 = vmatpush3.bf16.msra.mxu1 %v1184_v47 }
 0x15c   :  { %1034 = vmatprep.subr.bf16.mxu1 %v1185_v61 }
 0x15f   :  { %1035 = vmatpush3.bf16.msra.mxu1 %v1186_v62 }
 0x160   :  { %1036 = vmatprep.subr.bf16.mxu1 %v1187_v63 }
 0x163   :  { %1037 = vmatpush3.bf16.msra.mxu1 %v1188_v0 }
 0x219   :  { %v481_v51 = vpop.f32.mrb[0].mxu1 }
 0x21a   :  { %v482_v52 = vadd.f32 %v481_v51, %v280_v49  ;;  %v483_v53 = vpop.f32.mrb[1].mxu1 }
 0x21b   :  { %v484_v54 = vadd.f32 %v483_v53, %v284_v50  ;;  %v485_v55 = vpop.f32.mrb[2].mxu1 }
 0x21c   :  { %v488_v56 = vmax.f32 %v482_v52, 0.0  ;;  %v486_v57 = vpop.f32.mrb[3].mxu1 }
 0x21d   :  { %v489_v58 = vmax.f32 %v484_v54, 0.0 }
 0x21e   :  { %v490_v60 = vpack.c.bf16 %v488_v56, %v488_v56 }
 0x21f   :  { %v491_v59 = vpack.c.bf16 %v489_v58, %v489_v58 }
 0x221   :  { %728 = vmatprep.mubr.bf16.mxu0 %v491_v59 }
 0x222   :  { %729 = vmatmul.mubr.bf16.vlgmr.msra.gmra.mrb[4].mxu0 %v490_v60 }
 0x2f5   :  { %v730_v4 = vpop.f32.mrb[4].mxu0 }
 0x2f6   :  { %v731_v5 = vadd.f32 %v730_v4, %v529_v2  ;;  %v732_v6 = vpop.f32.mrb[5].mxu0 }
 0x2f7   :  { %v733_v7 = vadd.f32 %v732_v6, %v533_v3  ;;  %v734_v8 = vpop.f32.mrb[6].mxu0 }
 0x2f8   :  { %v737_v9 = vmax.f32 %v731_v5, 0.0  ;;  %v735_v10 = vpop.f32.mrb[7].mxu0 }
 0x2f9   :  { %v738_v11 = vmax.f32 %v733_v7, 0.0 }
 0x2fa   :  { %v739_v13 = vpack.c.bf16 %v737_v9, %v737_v9 }
 0x2fb   :  { %v740_v12 = vpack.c.bf16 %v738_v11, %v738_v11 }
 0x2fd   :  { %908 = vmatprep.mubr.bf16.mxu1 %v740_v12 }
 0x2fe   :  { %909 = vmatmul.mubr.bf16.vlgmr.msra.gmra.mrb[4].mxu1 %v739_v13 }
 0x3d1   :  { %v1038_v14 = vpop.f32.mrb[4].mxu1 }
 0x3d2   :  { %v1039_v16 = vpop.f32.mrb[5].mxu1 }
 0x3d3   :  { %v1040_v17 = vadd.f32 %v1039_v16, %v1038_v14  ;;  %v1041_v18 = vpop.f32.mrb[6].mxu1 }
 0x3d4   :  { %v1042_v19 = vpop.f32.mrb[7].mxu1 }
 0x3d5   :  { %v911_v20 = vadd.f32 %v1040_v17, %v1005_v15 }
 0x3d7   :  { %1189 = vtanh.f32 %v911_v20 }
 0x3e1   :  { %v1190_v21 = vpop.eup %1189 }
 0x3e2   :  { %917 = vst [vmem:[%s1452_s9] sm:$0xff] %v1190_v21 }
 0x3e3   :  { %922 = vsyncpa [#allocation3], 1 }
 0x3e4   :  { %923 = vsyncpa [#allocation5], 1 }
 0x3e5   :  { %924 = vsyncpa [#allocation8], 1 }

</bundles_post_ra>
